<compile_context>
chip_gen: v7x
topology: tpu7x:2x2x1
jax: 0.10.0
libtpu: 0.0.40
codegen_flags: <defaults>
</compile_context>

<pallas_src>
import logging
import math

import jax
import jax.numpy as jnp
from jax.experimental import pallas as pl
from jax.experimental.pallas import tpu as pltpu


_LANE = 128
_SUBLANE = 8
# Cap per-block bytes so that {in, out} x double-buffering (= 4 x block) fits
# comfortably under the scoped-VMEM limit on every generation
# (v5e default 16 MiB, v6e/v7x default 32 MiB, v7x physical 64 MiB).
_MAX_BLOCK_BYTES = 4 * 1024 * 1024
_VMEM_LIMIT_BYTES = 32 * 1024 * 1024


# ----------------------------------------------------------------------------
# Pallas kernel: identity pass-through (the only defined semantics of the
# abstract base class's forward).
# ----------------------------------------------------------------------------
def _identity_kernel(x_ref, o_ref):
    # TODO(synk): ModelBase.forward raises NotImplementedError; subclasses
    # define the real compute.  Only the pass-through hot path is realizable.
    o_ref[...] = x_ref[...]


def _lane_dense_layout(total: int):
    """Pick a (rows, lanes) factorization with a lane-dense last dim."""
    if total == 0 or total % _LANE != 0:
        return None
    for lanes in (4096, 2048, 1024, 512, 256, _LANE):
        if total % lanes == 0:
            return total // lanes, lanes
    return None


def _row_block(rows: int, lanes: int, itemsize: int) -> int:
    """Largest row-block that divides `rows`, is sublane(8)-aligned (or covers
    all rows), and keeps the block under the per-block VMEM budget."""
    max_rows = max(1, _MAX_BLOCK_BYTES // (lanes * itemsize))
    if rows <= max_rows:
        return rows                       # one block covers every row
    r = (max_rows // _SUBLANE) * _SUBLANE
    while r >= _SUBLANE:
        if rows % r == 0:
            return r
        r -= _SUBLANE
    return rows                           # no clean divisor -> single block


def _identity_forward(x: jax.Array) -> jax.Array:
    """Identity pass-through as a lane-dense, large-tile Pallas copy."""
    total = math.prod(x.shape) if x.ndim else 1
    layout = _lane_dense_layout(total)

    if layout is None:
        # Non-lane-aligned / degenerate shapes: single whole-array block
        # (block dims == full array dims satisfies the (8,128) exception).
        return pl.pallas_call(
            _identity_kernel,
            out_shape=jax.ShapeDtypeStruct(x.shape, x.dtype),
            input_output_aliases={0: 0},
        )(x)

    rows, lanes = layout
    x2d = x.reshape(rows, lanes)
    block_rows = _row_block(rows, lanes, x2d.dtype.itemsize)
    grid = (rows // block_rows,)

    y2d = pl.pallas_call(
        _identity_kernel,
        out_shape=jax.ShapeDtypeStruct((rows, lanes), x2d.dtype),
        grid_spec=pl.GridSpec(
            grid=grid,
            in_specs=[pl.BlockSpec((block_rows, lanes), lambda i: (i, 0))],
            out_specs=pl.BlockSpec((block_rows, lanes), lambda i: (i, 0)),
        ),
        # Identity: write the result back onto the input's HBM buffer instead
        # of allocating (and filling) a second tensor-sized buffer.
        input_output_aliases={0: 0},
        compiler_params=pltpu.CompilerParams(
            dimension_semantics=("parallel",),
            vmem_limit_bytes=_VMEM_LIMIT_BYTES,
        ),
    )(x2d)
    return y2d.reshape(x.shape)


# ----------------------------------------------------------------------------
# JAX-side mirror of the ModelBase bookkeeping (no learnable parameters in the
# base class __init__, so there is nothing to initialize numerically).
# ----------------------------------------------------------------------------
def _snake_type_name(obj) -> str:
    name = type(obj).__name__
    out = []
    for i, ch in enumerate(name):
        if ch.isupper() and i > 0:
            out.append("_")
        out.append(ch.lower())
    return "".join(out)


class ModelBase:
    """JAX/Pallas mirror of the abstract PyTorch ModelBase."""

    def __init__(
        self,
        input_shape=None,
        name=None,
        output_shape=None,
        ctor_kwargs=None,
        update_counter=None,
        path_provider=None,
        data_container=None,
        initializers=None,
        dynamic_ctx: dict = None,
        static_ctx: dict = None,
    ):
        self.logger = logging.getLogger(type(self).__name__)
        self.input_shape = input_shape
        self.output_shape = output_shape
        self.update_counter = update_counter
        self.path_provider = path_provider
        self.data_container = data_container
        self._optim = None
        # TODO(synk): create_collection/initializer_from_kwargs are framework
        # plumbing with no Pallas equivalent; kept as the raw argument.
        self.initializers = initializers

        if dynamic_ctx is None:
            self.dynamic_ctx = {}
        else:
            self.dynamic_ctx = dynamic_ctx

        if static_ctx is None:
            self.static_ctx = {}
            if self.input_shape is not None:
                self.static_ctx["input_shape"] = tuple(self.input_shape)
        else:
            self.static_ctx = static_ctx
            if self.input_shape is None and "input_shape" in self.static_ctx:
                self.input_shape = self.static_ctx["input_shape"]

        self.name = name or _snake_type_name(self)
        self.ctor_kwargs = ctor_kwargs
        if self.ctor_kwargs is not None and "update_counter" in self.ctor_kwargs:
            self.ctor_kwargs.pop("update_counter")
        self.is_initialized = False

    def forward(self, x: jax.Array) -> jax.Array:
        # Abstract in PyTorch (raises NotImplementedError).  Here we expose the
        # identity Pallas kernel so the hot path is a real on-device kernel.
        return _identity_forward(x)

    def __call__(self, x: jax.Array) -> jax.Array:
        return self.forward(x)

    @property
    def optim(self):
        return self._optim


if __name__ == "__main__":
    # Deterministic synthetic input, NCHW: batch=2, channels=4, spatial=16.
    key = jax.random.PRNGKey(0)
    x = jax.random.normal(key, (2, 4, 16, 16), dtype=jnp.float32)
    # Regenerate from the same key as the reference so the comparison is
    # independent of any buffer donation done by input_output_aliases.
    expected = jax.random.normal(key, (2, 4, 16, 16), dtype=jnp.float32)

    model = ModelBase(input_shape=(4, 16, 16), name="model_base")
    y = model(x)
    y = jax.block_until_ready(y)

    # Sanity-check: identity pass-through, same shape/dtype/values.
    assert y.shape == (2, 4, 16, 16) and y.dtype == jnp.float32
    assert bool(jnp.array_equal(y, expected))

    print("KERNEL_OK")
</pallas_src>

<mosaic_0001>
module attributes {stable_mosaic.version = 11 : i64} {
  func.func @_identity_kernel(%arg0: i32, %arg1: memref<1x2048xf32, #tpu.memory_space<vmem>>, %arg2: memref<1x2048xf32, #tpu.memory_space<vmem>>) attributes {dimension_semantics = [#tpu.dimension_semantics<parallel>], iteration_bounds = array<i64: 1>, scalar_prefetch = 0 : i64, scratch_operands = 0 : i64, tpu.core_type = #tpu.core_type<tc>, window_params = [{transform_indices = @transform_0, window_bounds = array<i64: 1, 2048>}, {transform_indices = @transform_1, window_bounds = array<i64: 1, 2048>}]} {
    %c0 = arith.constant 0 : index
    %c0_0 = arith.constant 0 : index
    %0 = vector.load %arg1[%c0, %c0_0] : memref<1x2048xf32, #tpu.memory_space<vmem>>, vector<1x2048xf32>
    %c0_1 = arith.constant 0 : index
    %c0_2 = arith.constant 0 : index
    %1 = vector.load %arg2[%c0_1, %c0_2] : memref<1x2048xf32, #tpu.memory_space<vmem>>, vector<1x2048xf32>
    tpu.vector_store %arg2[%c0_1, %c0_2], %0 {strides = array<i32>} : memref<1x2048xf32, #tpu.memory_space<vmem>>, vector<1x2048xf32>,
    return
  }
  func.func @transform_0(%arg0: i32) -> (i32, i32) {
    %c0_i32 = arith.constant 0 : i32
    %c0_i32_0 = arith.constant 0 : i32
    return %arg0, %c0_i32 : i32, i32
  }
  func.func @transform_1(%arg0: i32) -> (i32, i32) {
    %c0_i32 = arith.constant 0 : i32
    %c0_i32_0 = arith.constant 0 : i32
    return %arg0, %c0_i32 : i32, i32
  }
}

</mosaic_0001>

<bundles_post_ra>
// kernel: tpu_custom_call.1
= control target key start
LH: loop header
LB: loop body
LE: loop exit
PB: predicated region body
PF: predicated region fallthrough
CT: control target
= control target key end

     0   :  { %6 = vsyncpa [#allocation3], 0  ;;  %s126_s0 = inlined_call_operand.hbm [shape: f32[1,2048], index: 0, kind: input, shape index: {}, may-alias: {0,1}]   ;;  %s127_s1 = inlined_call_operand.hbm [shape: f32[1,2048], index: 1, kind: output, shape index: {}, may-alias: {0,1}]  }
   0x1   :  { %7 = vsyncpa [#allocation4], 0  ;;  %s90_s6 = smov [#allocation2]   ;;  %s42_s10 = scalar_lea.hbm %s126_s0, 256 }
   0x2   :  { %s14_s7 = sshll.u32 %s90_s6, 4  ;;  %p43_p0 = scmp.ne.s32.totalorder %s126_s0, %s42_s10  ;;  %s15_s7 = int_to_ptr.vmem [resolvable:$true] %s14_s7 }
   0x3   :  { %p46_p1 = scmp.lt.u32.totalorder %s42_s10, %s126_s0 }
   0x5   :  { %p48_p2 = pnand %p46_p1, %p43_p0 }
   0x7   :  { %51 = shalt.err (!%p48_p2)
}
   0x8   :  { %s52_s15 = scalar_lea.vmem %s15_s7, 256  ;;  %p57_p4 = scmp.lt.s32.totalorder %s15_s7, %s15_s7 }
   0x9   :  { %p53_p3 = scmp.ne.s32.totalorder %s15_s7, %s52_s15  ;;  %p58_p5 = scmp.lt.s32.totalorder %s52_s15, %s52_s15 }
   0xb   :  { %p59_p6 = por %p58_p5, %p57_p4 }
   0xd   :  { %p60_p7 = pnand %p59_p6, %p53_p3 }
   0xf   :  { %63 = shalt.err (!%p60_p7)
}
  0x10   :  { %17 = dma.hbm_to_vmem [thread:$0]  %s126_s0, 256, %s15_s7, [#allocation3]  }
  0x11   :  { %86 = dma.done.wait [#allocation3], 256  }
  0x12   :  { %87 = vsyncadd [#allocation3], 4294967040  ;;  %s91_s18 = smov [#allocation5]   ;;  %v21_v0 = vld [vmem:[#allocation2] sm:$0xff]  ;;  %v22_v1 = vld [vmem:[#allocation2 + $0x8] sm:$0xff] }
  0x13   :  { %s31_s19 = sshll.u32 %s91_s18, 4  ;;  %23 = vst [vmem:[#allocation5] sm:$0xff] %v21_v0  ;;  %24 = vst [vmem:[#allocation5 + $0x8] sm:$0xff] %v22_v1  ;;  %s32_s19 = int_to_ptr.vmem [resolvable:$true] %s31_s19 }
  0x14   :  { %s64_s20 = scalar_lea.vmem %s32_s19, 256  ;;  %p69_p9 = scmp.lt.s32.totalorder %s32_s19, %s32_s19 }
  0x15   :  { %p65_p8 = scmp.ne.s32.totalorder %s32_s19, %s64_s20  ;;  %p70_p10 = scmp.lt.s32.totalorder %s64_s20, %s64_s20 }
  0x17   :  { %p71_p11 = por %p70_p10, %p69_p9 }
  0x19   :  { %p72_p12 = pnand %p71_p11, %p65_p8 }
  0x1b   :  { %75 = shalt.err (!%p72_p12)
}
  0x1c   :  { %s76_s0 = scalar_lea.hbm %s127_s1, 256 }
  0x1d   :  { %p77_p13 = scmp.ne.s32.totalorder %s127_s1, %s76_s0  ;;  %p80_p0 = scmp.lt.u32.totalorder %s76_s0, %s127_s1 }
  0x1f   :  { %p82_p1 = pnand %p80_p0, %p77_p13 }
  0x21   :  { %85 = shalt.err (!%p82_p1)
}
  0x22   :  { %34 = dma.vmem_to_hbm [thread:$0]  %s32_s19, 256, %s127_s1, [#allocation4]  }
  0x23   :  { %88 = dma.done.wait [#allocation4], 256  }
  0x24   :  { %89 = vsyncadd [#allocation4], 4294967040 }
  0x25   :  { %38 = vsyncpa [#allocation3], 1 }
  0x26   :  { %39 = vsyncpa [#allocation4], 1 }

</bundles_post_ra>
